<compile_context>
chip_gen: v7x
topology: tpu7x:2x2x1
jax: 0.10.0
libtpu: 0.0.40
codegen_flags: <defaults>
</compile_context>

<pallas_src>
import functools

import jax
import jax.numpy as jnp
from jax.experimental import pallas as pl
from jax.experimental.pallas import tpu as pltpu

NUM_CLASSES = 500
STEM_C = 24
HEAD_C = 1280
LANE = 128   # channel padding granularity (TPU lane width)

# torchvision efficientnet_v2_m stage configuration:
# (block, expand_ratio, kernel, stride, in_c, out_c, num_layers)
STAGES = [
    ("fused", 1, 3, 1, 24, 24, 3),
    ("fused", 4, 3, 2, 24, 48, 5),
    ("fused", 4, 3, 2, 48, 80, 5),
    ("mb",    4, 3, 2, 80, 160, 7),
    ("mb",    6, 3, 1, 160, 176, 14),
    ("mb",    6, 3, 2, 176, 304, 18),
    ("mb",    6, 3, 1, 304, 512, 5),
]


def _ru(x, m):
    return (x + m - 1) // m * m


def _cp(c):
    return _ru(c, LANE)


def _pick_div(n, cands):
    for c in cands:
        if n % c == 0:
            return c
    return n


# ----------------------------- Pallas kernels -----------------------------

def _matmul_kernel(*refs, act, has_res):
    """o = act((a @ b) * scale + bias) [+ residual], accumulated over the K axis."""
    if has_res:
        a_ref, b_ref, s_ref, c_ref, r_ref, o_ref, acc_ref = refs
    else:
        a_ref, b_ref, s_ref, c_ref, o_ref, acc_ref = refs
        r_ref = None

    @pl.when(pl.program_id(2) == 0)
    def _():
        acc_ref[...] = jnp.zeros_like(acc_ref)

    acc_ref[...] += jnp.dot(a_ref[...], b_ref[...],
                            preferred_element_type=jnp.float32)

    @pl.when(pl.program_id(2) == pl.num_programs(2) - 1)
    def _():
        y = acc_ref[...] * s_ref[...] + c_ref[...]
        if act == "silu":
            y = y * jax.nn.sigmoid(y)
        elif act == "sigmoid":
            y = jax.nn.sigmoid(y)
        if has_res:
            y = y + r_ref[...].astype(jnp.float32)
        o_ref[...] = y.astype(o_ref.dtype)


def _conv3_kernel(xm_ref, xh_ref, w_ref, s_ref, c_ref, o_ref, xbuf, *,
                  act, res_center, tr, ow):
    """3x3 stride-1 conv on a spatially pre-padded NHWC row tile; the 2-row halo
    is a second view of the same HBM array.  The 9 taps are built in VMEM only."""
    xbuf[0:tr] = xm_ref[0]
    xbuf[tr:tr + 2] = xh_ref[0]
    cin = xbuf.shape[-1]
    acc = None
    for dh in range(3):
        for dw in range(3):
            a = xbuf[dh:dh + tr, dw:dw + ow, :].reshape(tr * ow, cin)
            d = jnp.dot(a, w_ref[dh * 3 + dw], preferred_element_type=jnp.float32)
            acc = d if acc is None else acc + d
    y = acc * s_ref[...] + c_ref[...]
    if act == "silu":
        y = y * jax.nn.sigmoid(y)
    if res_center:  # residual == conv input == center tap of the padded block
        y = y + xbuf[1:1 + tr, 1:1 + ow, :].reshape(tr * ow, cin).astype(jnp.float32)
    o_ref[0] = y.astype(o_ref.dtype)


def _dw_kernel(xp_ref, w_ref, s_ref, c_ref, y_ref, p_ref, *, oh, ow):
    """Depthwise 3x3 (stride 1) straight off the padded NHWC block: unrolled
    9-tap FMA + BN + SiLU, plus a fused global-average-pool output for SE."""
    acc = None
    for dh in range(3):
        for dw in range(3):
            tap = xp_ref[0, dh:dh + oh, dw:dw + ow, :].astype(jnp.float32)
            wk = w_ref[dh * 3 + dw:dh * 3 + dw + 1, :].astype(jnp.float32)  # (1, tc)
            t = tap * wk
            acc = t if acc is None else acc + t
    y = acc * s_ref[...] + c_ref[...]
    y = y * jax.nn.sigmoid(y)
    y_ref[0] = y.astype(y_ref.dtype)
    p_ref[...] = jnp.mean(y, axis=(0, 1), keepdims=True)


def _pw_gated_kernel(*refs, has_res):
    """Projection 1x1 conv with the SE channel gate fused on the A side."""
    if has_res:
        a_ref, g_ref, w_ref, s_ref, c_ref, r_ref, o_ref = refs
    else:
        a_ref, g_ref, w_ref, s_ref, c_ref, o_ref = refs
        r_ref = None
    ag = a_ref[0] * g_ref[0].astype(jnp.bfloat16)
    y = jnp.dot(ag, w_ref[...], preferred_element_type=jnp.float32)
    y = y * s_ref[...] + c_ref[...]
    if has_res:
        y = y + r_ref[0].astype(jnp.float32)
    o_ref[0] = y.astype(o_ref.dtype)


def _pool_kernel(x_ref, o_ref):
    # (1, HW, C) -> (1, 1, C) mean, f32 accumulation.
    o_ref[...] = jnp.mean(x_ref[...].astype(jnp.float32), axis=1, keepdims=True)


# ----------------------------- Pallas wrappers -----------------------------

@functools.partial(jax.jit, static_argnames=("act", "out_dtype"))
def matmul_bn_act(a, wm, scale2, bias2, residual=None, *, act="none",
                  out_dtype=jnp.bfloat16):
    """a:(M,K) @ wm:(Kp,Np) (pre-packed bf16) with fused scale/bias/act [+res]."""
    M, K = a.shape
    Kp, Np = wm.shape
    a = a.astype(jnp.bfloat16)
    if K != Kp:                                 # only stem / stride-2 im2col convs
        a = jnp.pad(a, ((0, 0), (0, Kp - K)))
    Mp = _ru(max(M, 16), 16)                    # bf16-friendly sublane multiple
    if Mp != M:
        a = jnp.pad(a, ((0, Mp - M), (0, 0)))
    tm = min(256, Mp)
    tn = _pick_div(Np, (1024, 640, 512, 384, 256, 128))
    tk = _pick_div(Kp, (640, 512, 384, 256, 128))

    has_res = residual is not None
    inputs = [a, wm, scale2, bias2]
    in_specs = [pl.BlockSpec((tm, tk), lambda i, j, k: (i, k)),
                pl.BlockSpec((tk, tn), lambda i, j, k: (k, j)),
                pl.BlockSpec((1, tn), lambda i, j, k: (0, j)),
                pl.BlockSpec((1, tn), lambda i, j, k: (0, j))]
    if has_res:
        r = residual.astype(jnp.bfloat16)
        if Mp != M:
            r = jnp.pad(r, ((0, Mp - M), (0, 0)))
        inputs.append(r)
        in_specs.append(pl.BlockSpec((tm, tn), lambda i, j, k: (i, j)))

    out = pl.pallas_call(
        functools.partial(_matmul_kernel, act=act, has_res=has_res),
        out_shape=jax.ShapeDtypeStruct((Mp, Np), out_dtype),
        grid_spec=pltpu.PrefetchScalarGridSpec(
            num_scalar_prefetch=0,
            grid=(pl.cdiv(Mp, tm), Np // tn, Kp // tk),
            in_specs=in_specs,
            out_specs=pl.BlockSpec((tm, tn), lambda i, j, k: (i, j)),
            scratch_shapes=[pltpu.VMEM((tm, tn), jnp.float32)]),
        compiler_params=pltpu.CompilerParams(
            dimension_semantics=("parallel", "parallel", "arbitrary")),
    )(*inputs)
    return out[:M] if Mp != M else out


def _extract_patches(x, k, stride, pad):
    """x: (N,H,W,C) -> patches (N,OH,OW,K*K,C).  Only used for the stem and the
    three stride-2 regular 3x3 convs."""
    N, H, W, C = x.shape
    xp = jnp.pad(x, ((0, 0), (pad, pad), (pad, pad), (0, 0)))
    OH = (H + 2 * pad - k) // stride + 1
    OW = (W + 2 * pad - k) // stride + 1
    cols = []
    for i in range(k):
        for j in range(k):
            cols.append(xp[:, i:i + stride * OH:stride, j:j + stride * OW:stride, :])
    return jnp.stack(cols, axis=3), OH, OW


@functools.partial(jax.jit, static_argnames=("k", "stride", "act"))
def conv_im2col_bn_act(x, wm, scale2, bias2, residual=None, *, k=3, stride=2,
                       act="silu"):
    N, H, W, C = x.shape
    p, OH, OW = _extract_patches(x, k, stride, (k - 1) // 2)
    a = p.reshape(N * OH * OW, k * k * C)
    r = None if residual is None else residual.reshape(N * OH * OW, -1)
    y = matmul_bn_act(a, wm, scale2, bias2, r, act=act)
    return y.reshape(N, OH, OW, wm.shape[1])


@functools.partial(jax.jit, static_argnames=("act", "res_from_center"))
def conv3x3_s1_bn_act(x, w9, scale2, bias2, *, act="silu", res_from_center=False):
    """3x3 stride-1 conv + BN + act (+ fused input residual) via in-VMEM halo
    patches; the NHWC activation is read from HBM ~once (no im2col blowup)."""
    N, H, W, C = x.shape
    Np = w9.shape[2]
    tr = H
    for cand in (32, 28, 16, 14, 8, 4, 2):
        if H % cand == 0:
            tr = cand
            break
    if H % 2 != 0 or (tr * W) % 8 != 0:
        # layout-unfriendly spatial size: fall back to the im2col matmul path.
        wflat = w9.reshape(9 * C, Np)
        r = x.reshape(N * H * W, C) if res_from_center else None
        p, _, _ = _extract_patches(x, 3, 1, 1)
        a = p.reshape(N * H * W, 9 * C)
        y = matmul_bn_act(a, wflat, scale2, bias2, r, act=act)
        return y.reshape(N, H, W, Np)

    tn = _pick_div(Np, (512, 384, 256, 128))
    if res_from_center:
        assert Np == C and tn == Np, "fused input residual needs Cout_p == Cin_p"
    Wp = W + 2
    xpad = jnp.pad(x.astype(jnp.bfloat16), ((0, 0), (1, 1), (1, 1), (0, 0)))
    out = pl.pallas_call(
        functools.partial(_conv3_kernel, act=act, res_center=res_from_center,
                          tr=tr, ow=W),
        out_shape=jax.ShapeDtypeStruct((N, H * W, Np), jnp.bfloat16),
        grid_spec=pltpu.PrefetchScalarGridSpec(
            num_scalar_prefetch=0,
            grid=(N, H // tr, Np // tn),
            in_specs=[pl.BlockSpec((1, tr, Wp, C), lambda n, t, j: (n, t, 0, 0)),
                      pl.BlockSpec((1, 2, Wp, C),
                                   lambda n, t, j: (n, (t + 1) * (tr // 2), 0, 0)),
                      pl.BlockSpec((9, C, tn), lambda n, t, j: (0, 0, j)),
                      pl.BlockSpec((1, tn), lambda n, t, j: (0, j)),
                      pl.BlockSpec((1, tn), lambda n, t, j: (0, j))],
            out_specs=pl.BlockSpec((1, tr * W, tn), lambda n, t, j: (n, t, j)),
            scratch_shapes=[pltpu.VMEM((tr + 2, Wp, C), jnp.bfloat16)]),
        compiler_params=pltpu.CompilerParams(
            dimension_semantics=("parallel", "parallel", "parallel")),
    )(xpad, xpad, w9, scale2, bias2)
    return out.reshape(N, H, W, Np)


@functools.partial(jax.jit, static_argnames=("stride",))
def dwconv3_bn_silu(x, w9, scale2, bias2, *, stride=1):
    """Depthwise 3x3 + BN + SiLU directly on NHWC (no HBM patch tensor).
    Returns (y, pooled); pooled (spatial mean, for SE) is valid for stride 1."""
    N, H, W, C = x.shape
    tc = _pick_div(C, (1024, 640, 512, 384, 256, 128))
    xpad = jnp.pad(x.astype(jnp.bfloat16), ((0, 0), (1, 1), (1, 1), (0, 0)))
    y, pooled = pl.pallas_call(
        functools.partial(_dw_kernel, oh=H, ow=W),
        out_shape=(jax.ShapeDtypeStruct((N, H, W, C), jnp.bfloat16),
                   jax.ShapeDtypeStruct((N, 1, C), jnp.float32)),
        grid_spec=pltpu.PrefetchScalarGridSpec(
            num_scalar_prefetch=0,
            grid=(N, C // tc),
            in_specs=[pl.BlockSpec((1, H + 2, W + 2, tc),
                                   lambda n, c: (n, 0, 0, c)),
                      pl.BlockSpec((9, tc), lambda n, c: (0, c)),
                      pl.BlockSpec((1, tc), lambda n, c: (0, c)),
                      pl.BlockSpec((1, tc), lambda n, c: (0, c))],
            out_specs=(pl.BlockSpec((1, H, W, tc), lambda n, c: (n, 0, 0, c)),
                       pl.BlockSpec((1, 1, tc), lambda n, c: (n, 0, c)))),
        compiler_params=pltpu.CompilerParams(
            dimension_semantics=("parallel", "parallel")),
    )(xpad, w9, scale2, bias2)
    if stride == 2:
        # TODO(synk): the 2 stride-2 depthwise layers are computed at stride 1 and
        # subsampled; their SE pool is recomputed by the caller on the subsampled y.
        return y[:, ::2, ::2, :], None
    return y, pooled


@jax.jit
def pw_gated_conv(x, gate, wm, scale2, bias2, residual=None):
    """MBConv projection 1x1 conv with the per-(sample,channel) SE gate fused on
    the A side, plus fused BN and residual add."""
    N, H, W, K = x.shape
    HW = H * W
    Np = wm.shape[1]
    a3 = x.reshape(N, HW, K).astype(jnp.bfloat16)
    g3 = gate.reshape(N, 1, K)
    tn = _pick_div(Np, (512, 384, 256, 128))
    tm = HW if HW <= 256 else 256
    has_res = residual is not None
    inputs = [a3, g3, wm, scale2, bias2]
    in_specs = [pl.BlockSpec((1, tm, K), lambda b, i, j: (b, i, 0)),
                pl.BlockSpec((1, 1, K), lambda b, i, j: (b, 0, 0)),
                pl.BlockSpec((K, tn), lambda b, i, j: (0, j)),
                pl.BlockSpec((1, tn), lambda b, i, j: (0, j)),
                pl.BlockSpec((1, tn), lambda b, i, j: (0, j))]
    if has_res:
        inputs.append(residual.reshape(N, HW, Np).astype(jnp.bfloat16))
        in_specs.append(pl.BlockSpec((1, tm, tn), lambda b, i, j: (b, i, j)))
    out = pl.pallas_call(
        functools.partial(_pw_gated_kernel, has_res=has_res),
        out_shape=jax.ShapeDtypeStruct((N, HW, Np), jnp.bfloat16),
        grid_spec=pltpu.PrefetchScalarGridSpec(
            num_scalar_prefetch=0,
            grid=(N, pl.cdiv(HW, tm), Np // tn),
            in_specs=in_specs,
            out_specs=pl.BlockSpec((1, tm, tn), lambda b, i, j: (b, i, j))),
        compiler_params=pltpu.CompilerParams(
            dimension_semantics=("parallel", "parallel", "parallel")),
    )(*inputs)
    return out.reshape(N, H, W, Np)


@functools.partial(jax.jit, static_argnames=("act",))
def pointwise_conv(x, wm, scale2, bias2, residual=None, *, act="silu"):
    N, H, W, C = x.shape
    a = x.reshape(N * H * W, C)
    r = None if residual is None else residual.reshape(N * H * W, -1)
    y = matmul_bn_act(a, wm, scale2, bias2, r, act=act)
    return y.reshape(N, H, W, wm.shape[1])


@jax.jit
def global_avg_pool(x3):
    """(N, HW, C) bf16 -> (N, C) f32 mean over spatial positions."""
    N, HW, C = x3.shape
    out = pl.pallas_call(
        _pool_kernel,
        out_shape=jax.ShapeDtypeStruct((N, 1, C), jnp.float32),
        grid_spec=pltpu.PrefetchScalarGridSpec(
            num_scalar_prefetch=0,
            grid=(N,),
            in_specs=[pl.BlockSpec((1, HW, C), lambda n: (n, 0, 0))],
            out_specs=pl.BlockSpec((1, 1, C), lambda n: (n, 0, 0))),
        compiler_params=pltpu.CompilerParams(
            dimension_semantics=("parallel",)),
    )(x3)
    return out.reshape(N, C)


# ----------------------------- weight packing -------------------------------

def _pad2d(w2, kp, np_):
    return jnp.zeros((kp, np_), jnp.bfloat16).at[:w2.shape[0], :w2.shape[1]].set(
        w2.astype(jnp.bfloat16))


def _pack_vec(v, np_):
    return jnp.zeros((1, np_), jnp.float32).at[0, :v.shape[0]].set(
        v.astype(jnp.float32))


def _pack_pw(w, cin_p):
    """(Cout, Cin, 1, 1) -> (cin_p, ru(Cout,128)) bf16."""
    cout, cin = w.shape[:2]
    return _pad2d(w.reshape(cout, cin).T, cin_p, _cp(cout))


def _pack_conv_flat(w):
    """(Cout, Cin, KH, KW) -> (ru(KH*KW*Cin,128), ru(Cout,128)) bf16 (im2col)."""
    cout, cin, kh, kw = w.shape
    wm = jnp.transpose(w, (2, 3, 1, 0)).reshape(kh * kw * cin, cout)
    return _pad2d(wm, _ru(kh * kw * cin, 128), _cp(cout))


def _pack_conv3_halo(w, cin_p):
    """(Cout, Cin, 3, 3) -> (9, cin_p, ru(Cout,128)) bf16 for the halo kernel."""
    cout, cin, kh, kw = w.shape
    w9 = jnp.transpose(w, (2, 3, 1, 0)).reshape(kh * kw, cin, cout)
    out = jnp.zeros((kh * kw, cin_p, _cp(cout)), jnp.bfloat16)
    return out.at[:, :cin, :cout].set(w9.astype(jnp.bfloat16))


def _pack_dw(w, cp):
    """(C, 1, 3, 3) -> (9, cp) bf16."""
    c = w.shape[0]
    w9 = jnp.transpose(w[:, 0], (1, 2, 0)).reshape(9, c)
    return jnp.zeros((9, cp), jnp.bfloat16).at[:, :c].set(w9.astype(jnp.bfloat16))


def _pack_linear(w):
    cout, cin = w.shape
    return _pad2d(w.T, _ru(cin, 128), _cp(cout))


def pack_params(params):
    """Pre-pack all weights once (transpose, channel-pad to 128 multiples, bf16)."""
    pk = {"stem": (_pack_conv_flat(params["stem_w"]),
                   _pack_vec(params["stem_s"], _cp(STEM_C)),
                   _pack_vec(params["stem_b"], _cp(STEM_C)))}
    blocks = []
    for p in params["blocks"]:
        cin_p, cout_p = _cp(p["in"]), _cp(p["out"])
        q = {"type": p["type"], "stride": p["stride"], "in": p["in"],
             "out": p["out"], "expand_ratio": p["expand_ratio"]}
        if p["type"] == "fused":
            c1out_p = _cp(p["w1"].shape[0])
            if p["stride"] == 1:
                q["c1"] = (_pack_conv3_halo(p["w1"], cin_p),
                           _pack_vec(p["s1"], c1out_p), _pack_vec(p["b1"], c1out_p))
            else:
                q["c1"] = (_pack_conv_flat(p["w1"]),
                           _pack_vec(p["s1"], c1out_p), _pack_vec(p["b1"], c1out_p))
            if p["expand_ratio"] != 1:
                q["c2"] = (_pack_pw(p["w2"], c1out_p),
                           _pack_vec(p["s2"], cout_p), _pack_vec(p["b2"], cout_p))
        else:
            cexp = p["we"].shape[0]
            cexp_p = _cp(cexp)
            sq = p["w_sq"].shape[0]
            sq_p = _cp(sq)
            q["ce"] = (_pack_pw(p["we"], cin_p),
                       _pack_vec(p["s_e"], cexp_p), _pack_vec(p["b_e"], cexp_p))
            q["dw"] = (_pack_dw(p["wd"], cexp_p),
                       _pack_vec(p["s_d"], cexp_p), _pack_vec(p["b_d"], cexp_p))
            q["sq"] = (_pack_pw(p["w_sq"], cexp_p),
                       _pack_vec(jnp.ones((sq,), jnp.float32), sq_p),
                       _pack_vec(p["b_sq"], sq_p))
            q["ex"] = (_pack_pw(p["w_ex"], sq_p),
                       _pack_vec(jnp.ones((cexp,), jnp.float32), cexp_p),
                       _pack_vec(p["b_ex"], cexp_p))
            q["cp"] = (_pack_pw(p["wp"], cexp_p),
                       _pack_vec(p["s_p"], cout_p), _pack_vec(p["b_p"], cout_p))
        blocks.append(q)
    pk["blocks"] = blocks
    pk["head"] = (_pack_pw(params["head_w"], _cp(STAGES[-1][5])),
                  _pack_vec(params["head_s"], _cp(HEAD_C)),
                  _pack_vec(params["head_b"], _cp(HEAD_C)))
    nc = params["fc_w"].shape[0]
    pk["fc"] = (_pack_linear(params["fc_w"]),
                _pack_vec(jnp.ones((nc,), jnp.float32), _cp(nc)),
                _pack_vec(params["fc_b"], _cp(nc)))
    return pk


# ----------------------------- parameters (deterministic synthetic init) ---

class _ParamGen:
    def __init__(self, key):
        self._key = key
        self._i = 0

    def _next(self):
        self._i += 1
        return jax.random.fold_in(self._key, self._i)

    def conv(self, cout, cin, k):
        fan_in = cin * k * k
        return (jax.random.normal(self._next(), (cout, cin, k, k), jnp.float32)
                * (2.0 / fan_in) ** 0.5)

    def dwconv(self, c, k):
        return (jax.random.normal(self._next(), (c, 1, k, k), jnp.float32)
                * (2.0 / (k * k)) ** 0.5)

    def bn(self, c):
        # eval-mode BatchNorm folded into per-channel scale & bias.
        scale = 1.0 + 0.05 * jax.random.normal(self._next(), (c,), jnp.float32)
        bias = 0.05 * jax.random.normal(self._next(), (c,), jnp.float32)
        return scale, bias

    def bias(self, c):
        return 0.05 * jax.random.normal(self._next(), (c,), jnp.float32)

    def linear(self, cout, cin):
        w = jax.random.normal(self._next(), (cout, cin), jnp.float32) / cin ** 0.5
        b = jnp.zeros((cout,), jnp.float32)
        return w, b


def make_params(key, num_classes=NUM_CLASSES):
    # TODO(synk): pretrained IMAGENET1K_V1 weights cannot be loaded in-script;
    # deterministic synthetic parameters with matching shapes are used instead.
    g = _ParamGen(key)
    params = {"stem_w": g.conv(STEM_C, 3, 3)}
    params["stem_s"], params["stem_b"] = g.bn(STEM_C)
    blocks = []
    for btype, exp, k, stride, cin, cout, reps in STAGES:
        for r in range(reps):
            b_in = cin if r == 0 else cout
            b_stride = stride if r == 0 else 1
            b_exp = b_in * exp
            p = {"type": btype, "stride": b_stride, "in": b_in, "out": cout,
                 "expand_ratio": exp}
            if btype == "fused":
                if exp == 1:
                    p["w1"] = g.conv(cout, b_in, k)
                    p["s1"], p["b1"] = g.bn(cout)
                else:
                    p["w1"] = g.conv(b_exp, b_in, k)
                    p["s1"], p["b1"] = g.bn(b_exp)
                    p["w2"] = g.conv(cout, b_exp, 1)
                    p["s2"], p["b2"] = g.bn(cout)
            else:
                sq = max(1, b_in // 4)
                p["we"] = g.conv(b_exp, b_in, 1)
                p["s_e"], p["b_e"] = g.bn(b_exp)
                p["wd"] = g.dwconv(b_exp, k)
                p["s_d"], p["b_d"] = g.bn(b_exp)
                p["w_sq"] = g.conv(sq, b_exp, 1)
                p["b_sq"] = g.bias(sq)
                p["w_ex"] = g.conv(b_exp, sq, 1)
                p["b_ex"] = g.bias(b_exp)
                p["wp"] = g.conv(cout, b_exp, 1)
                p["s_p"], p["b_p"] = g.bn(cout)
            blocks.append(p)
    params["blocks"] = blocks
    params["head_w"] = g.conv(HEAD_C, STAGES[-1][5], 1)
    params["head_s"], params["head_b"] = g.bn(HEAD_C)
    params["fc_w"], params["fc_b"] = g.linear(num_classes, HEAD_C)
    return params


# ----------------------------- forward pass --------------------------------

def efficientnet_v2_m_forward(packed, x_nchw):
    # NCHW (PyTorch) -> NHWC bf16; channels zero-padded to 128 and carried padded.
    x = jnp.transpose(x_nchw, (0, 2, 3, 1)).astype(jnp.bfloat16)
    wm, s, b = packed["stem"]
    x = conv_im2col_bn_act(x, wm, s, b, k=3, stride=2, act="silu")
    for q in packed["blocks"]:
        use_res = q["stride"] == 1 and q["in"] == q["out"]
        res = x if use_res else None
        if q["type"] == "fused":
            wm, s, b = q["c1"]
            if q["stride"] == 1:
                x = conv3x3_s1_bn_act(
                    x, wm, s, b, act="silu",
                    res_from_center=(use_res and q["expand_ratio"] == 1))
            else:
                xin = x[..., :q["in"]] if x.shape[-1] != q["in"] else x
                x = conv_im2col_bn_act(xin, wm, s, b, k=3, stride=2, act="silu")
            if q["expand_ratio"] != 1:
                wm, s, b = q["c2"]
                x = pointwise_conv(x, wm, s, b, res, act="none")
        else:  # MBConv with squeeze-excitation
            wm, s, b = q["ce"]
            x = pointwise_conv(x, wm, s, b, act="silu")
            wm, s, b = q["dw"]
            x, pooled = dwconv3_bn_silu(x, wm, s, b, stride=q["stride"])
            if pooled is None:  # stride-2 fallback: pool the subsampled output
                n_, h_, w_, c_ = x.shape
                pooled = global_avg_pool(x.reshape(n_, h_ * w_, c_))
            else:
                pooled = pooled.reshape(pooled.shape[0], -1)
            wm, s, b = q["sq"]
            g = matmul_bn_act(pooled, wm, s, b, act="silu")
            wm, s, b = q["ex"]
            g = matmul_bn_act(g, wm, s, b, act="sigmoid", out_dtype=jnp.float32)
            wm, s, b = q["cp"]
            x = pw_gated_conv(x, g, wm, s, b, res)
        # TODO(synk): stochastic depth is identity in eval mode (not implemented).
    wm, s, b = packed["head"]
    x = pointwise_conv(x, wm, s, b, act="silu")
    n_, h_, w_, c_ = x.shape
    pooled = global_avg_pool(x.reshape(n_, h_ * w_, c_))
    # classifier = Dropout(0.3) + Linear(1280, 500); dropout is identity in eval.
    # TODO(synk): training-mode dropout not implemented (inference forward only).
    fcw, fcs, fcb = packed["fc"]
    logits = matmul_bn_act(pooled, fcw, fcs, fcb, act="none",
                           out_dtype=jnp.float32)
    return logits[:, :NUM_CLASSES]


if __name__ == "__main__":
    key = jax.random.PRNGKey(0)
    params = make_params(key, num_classes=NUM_CLASSES)
    packed = pack_params(params)
    x = jax.random.normal(jax.random.fold_in(key, 12345), (2, 3, 32, 32),
                          jnp.float32)
    logits = efficientnet_v2_m_forward(packed, x)
    logits = jax.block_until_ready(logits)
    assert logits.shape == (2, NUM_CLASSES), logits.shape
    assert bool(jnp.all(jnp.isfinite(logits)))
    print("KERNEL_OK")
</pallas_src>

<mosaic_0001>
module attributes {stable_mosaic.version = 11 : i64} {
  func.func @_matmul_kernel(%arg0: i32, %arg1: i32, %arg2: i32, %arg3: memref<256x128xbf16, #tpu.memory_space<vmem>>, %arg4: memref<128x128xbf16, #tpu.memory_space<vmem>>, %arg5: memref<1x128xf32, #tpu.memory_space<vmem>>, %arg6: memref<1x128xf32, #tpu.memory_space<vmem>>, %arg7: memref<256x128xbf16, #tpu.memory_space<vmem>>, %arg8: memref<256x128xf32, #tpu.memory_space<vmem>>) attributes {dimension_semantics = [#tpu.dimension_semantics<parallel>, #tpu.dimension_semantics<parallel>, #tpu.dimension_semantics<arbitrary>], iteration_bounds = array<i64: 2, 1, 1>, scalar_prefetch = 0 : i64, scratch_operands = 1 : i64, tpu.core_type = #tpu.core_type<tc>, window_params = [{transform_indices = @transform_0, window_bounds = array<i64: 256, 128>}, {transform_indices = @transform_1, window_bounds = array<i64: 128, 128>}, {transform_indices = @transform_2, window_bounds = array<i64: 1, 128>}, {transform_indices = @transform_3, window_bounds = array<i64: 1, 128>}, {transform_indices = @transform_4, window_bounds = array<i64: 256, 128>}]} {
    %c0_i32 = arith.constant 0 : i32
    %0 = arith.cmpi eq, %arg2, %c0_i32 : i32
    %1 = arith.extui %0 : i1 to i32
    %c0_i32_0 = arith.constant 0 : i32
    %2 = arith.cmpi ne, %1, %c0_i32_0 : i32
    scf.if %2 {
      %cst_10 = arith.constant 0.000000e+00 : f32
      %12 = vector.broadcast %cst_10 : f32 to vector<256x128xf32>
      %c0_11 = arith.constant 0 : index
      %c0_12 = arith.constant 0 : index
      %13 = vector.load %arg8[%c0_11, %c0_12] : memref<256x128xf32, #tpu.memory_space<vmem>>, vector<256x128xf32>
      tpu.vector_store %arg8[%c0_11, %c0_12], %12 {strides = array<i32>} : memref<256x128xf32, #tpu.memory_space<vmem>>, vector<256x128xf32>,
    } else {
    }
    %c0 = arith.constant 0 : index
    %c0_1 = arith.constant 0 : index
    %3 = vector.load %arg8[%c0, %c0_1] : memref<256x128xf32, #tpu.memory_space<vmem>>, vector<256x128xf32>
    %c0_2 = arith.constant 0 : index
    %c0_3 = arith.constant 0 : index
    %4 = vector.load %arg3[%c0_2, %c0_3] : memref<256x128xbf16, #tpu.memory_space<vmem>>, vector<256x128xbf16>
    %c0_4 = arith.constant 0 : index
    %c0_5 = arith.constant 0 : index
    %5 = vector.load %arg4[%c0_4, %c0_5] : memref<128x128xbf16, #tpu.memory_space<vmem>>, vector<128x128xbf16>
    %cst = arith.constant dense<0.000000e+00> : vector<256x128xf32>
    %6 = tpu.matmul %4, %5, %cst {dimension_numbers = #tpu.dot_dimension_numbers<[1], [0], [0], [1], [0, 0, 1, 1], [], []>} : vector<256x128xbf16>, vector<128x128xbf16>, vector<256x128xf32> -> vector<256x128xf32>
    %7 = arith.addf %3, %6 : vector<256x128xf32>
    %c0_6 = arith.constant 0 : index
    %c0_7 = arith.constant 0 : index
    %8 = vector.load %arg8[%c0_6, %c0_7] : memref<256x128xf32, #tpu.memory_space<vmem>>, vector<256x128xf32>
    tpu.vector_store %arg8[%c0_6, %c0_7], %7 {strides = array<i32>} : memref<256x128xf32, #tpu.memory_space<vmem>>, vector<256x128xf32>,
    %c0_i32_8 = arith.constant 0 : i32
    %9 = arith.cmpi eq, %arg2, %c0_i32_8 : i32
    %10 = arith.extui %9 : i1 to i32
    %c0_i32_9 = arith.constant 0 : i32
    %11 = arith.cmpi ne, %10, %c0_i32_9 : i32
    scf.if %11 {
      %c0_10 = arith.constant 0 : index
      %c0_11 = arith.constant 0 : index
      %12 = vector.load %arg8[%c0_10, %c0_11] : memref<256x128xf32, #tpu.memory_space<vmem>>, vector<256x128xf32>
      %c0_12 = arith.constant 0 : index
      %c0_13 = arith.constant 0 : index
      %13 = vector.load %arg5[%c0_12, %c0_13] : memref<1x128xf32, #tpu.memory_space<vmem>>, vector<1x128xf32>
      %14 = vector.broadcast %13 : vector<1x128xf32> to vector<256x128xf32>
      %15 = arith.mulf %12, %14 : vector<256x128xf32>
      %c0_14 = arith.constant 0 : index
      %c0_15 = arith.constant 0 : index
      %16 = vector.load %arg6[%c0_14, %c0_15] : memref<1x128xf32, #tpu.memory_space<vmem>>, vector<1x128xf32>
      %17 = vector.broadcast %16 : vector<1x128xf32> to vector<256x128xf32>
      %18 = arith.addf %15, %17 : vector<256x128xf32>
      %19 = arith.negf %18 : vector<256x128xf32>
      %20 = math.exp %19 : vector<256x128xf32>
      %cst_16 = arith.constant 1.000000e+00 : f32
      %21 = vector.broadcast %cst_16 : f32 to vector<256x128xf32>
      %22 = arith.addf %21, %20 : vector<256x128xf32>
      %23 = arith.divf %21, %22 : vector<256x128xf32>
      %24 = arith.mulf %18, %23 : vector<256x128xf32>
      %25 = arith.truncf %24 : vector<256x128xf32> to vector<256x128xbf16>
      %c0_17 = arith.constant 0 : index
      %c0_18 = arith.constant 0 : index
      %26 = vector.load %arg7[%c0_17, %c0_18] : memref<256x128xbf16, #tpu.memory_space<vmem>>, vector<256x128xbf16>
      tpu.vector_store %arg7[%c0_17, %c0_18], %25 {strides = array<i32>} : memref<256x128xbf16, #tpu.memory_space<vmem>>, vector<256x128xbf16>,
    } else {
    }
    return
  }
  func.func @transform_0(%arg0: i32, %arg1: i32, %arg2: i32) -> (i32, i32) {
    %c0_i32 = arith.constant 0 : i32
    return %arg0, %arg2 : i32, i32
  }
  func.func @transform_1(%arg0: i32, %arg1: i32, %arg2: i32) -> (i32, i32) {
    %c0_i32 = arith.constant 0 : i32
    return %arg2, %arg1 : i32, i32
  }
  func.func @transform_2(%arg0: i32, %arg1: i32, %arg2: i32) -> (i32, i32) {
    %c0_i32 = arith.constant 0 : i32
    %c0_i32_0 = arith.constant 0 : i32
    return %c0_i32, %arg1 : i32, i32
  }
  func.func @transform_3(%arg0: i32, %arg1: i32, %arg2: i32) -> (i32, i32) {
    %c0_i32 = arith.constant 0 : i32
    %c0_i32_0 = arith.constant 0 : i32
    return %c0_i32, %arg1 : i32, i32
  }
  func.func @transform_4(%arg0: i32, %arg1: i32, %arg2: i32) -> (i32, i32) {
    %c0_i32 = arith.constant 0 : i32
    return %arg0, %arg1 : i32, i32
  }
}

</mosaic_0001>

<bundles_post_ra>
// kernel: matmul_bn_act.1
= control target key start
LH: loop header
LB: loop body
LE: loop exit
PB: predicated region body
PF: predicated region fallthrough
CT: control target
= control target key end

     0   :  { %9 = vsyncpa [#allocation4], 0  ;;  %s2463_s0 = inlined_call_operand.vmem [shape: bf16[512,128], index: 0, kind: input, shape index: {}]   ;;  %s2464_s1 = inlined_call_operand.vmem [shape: bf16[128,128], index: 1, kind: input, shape index: {}]   ;;  %s2465_s2 = inlined_call_operand.vmem [shape: f32[1,128], index: 2, kind: input, shape index: {}]   ;;  %s2466_s3 = inlined_call_operand.vmem [shape: f32[1,128], index: 3, kind: input, shape index: {}]   ;;  %s2467_s4 = inlined_call_operand.hbm [shape: bf16[512,128], index: 4, kind: output, shape index: {}]  }
   0x1   :  { %11 = vsyncpa [#allocation4 + $0x1], 0  ;;  %s2049_s15 = smov 0   ;;  %s2051_s16 = smov 0  }
   0x2   :  { %s2053_s17 = smov 0   ;;  %s2055_s18 = smov 0  }
   0x3   :  { %s2057_s19 = smov 0   ;;  %s2059_s20 = smov 0  }
   0x4 LB: > { %s1410_s21 = sadd.s32 4294967295, %s2019_s20   ;;  %s1411_s22 = sadd.s32 4294967294, %s2019_s20   ;;  %s2019_s20 = sphi %s2059_s20, %s17_s20   ;;  %s2015_s19 = sphi %s2057_s19, %s2474_s19   ;;  %s2011_s18 = sphi %s2055_s18, %s2473_s18   ;;  %s2007_s17 = sphi %s2053_s17, %s2472_s17   ;;  %s2003_s16 = sphi %s2051_s16, %s2471_s16   ;;  %s1999_s15 = sphi %s2049_s15, %s2470_s15  }
   0x5   : > { %s36_s23 = sadd.s32 1, %s2015_s19  ;;  %s153_s24 = sadd.s32 1, %s2007_s17 }
   0x6   : > { %p38_p0 = scmp.ge.s32.totalorder %s36_s23, 2  ;;  %p163_p1 = scmp.ne.s32.totalorder %s2007_s17, %s2003_s16 }
   0x7   : > { %p164_p2 = scmp.eq.s32.totalorder %s1410_s21, 1  ;;  %p169_p3 = scmp.ne.s32.totalorder %s2003_s16, %s1999_s15 }
   0x8   : > { %s2476_s23 = smov (%p38_p0, %s36_s23), 0  ;;  %p170_p5 = scmp.eq.s32.totalorder %s1411_s22, 1 }
   0x9   : > { %p2089_p4 = por %p164_p2, %p163_p1  ;;  %s148_s26 = ssub.s32 %s2015_s19, %s2476_s23 }
   0xa   : > { %p1417_p6 = scmp.ge.s32.totalorder %s2019_s20, 1  ;;  %p151_p7 = scmp.eq.s32.totalorder %s148_s26, 0 }
   0xb   : > { %p2096_p8 = por %p170_p5, %p169_p3  ;;  %p224_p9 = scmp.lt.s32.totalorder %s2019_s20, 3 }
   0xc   : > { %s2102_s28 = scalar_select %p151_p7, %s2007_s17, %s153_s24  }
   0xd   : > { %p225_p10 = pnand %p1417_p6, %p224_p9 }
   0xe   : > { %v1789_v0 = vld [vmem:[%s2464_s1] sm:$0xff] (!%p225_p10)   ;;  %s1419_s5 = sshll.u32 (!%p225_p10), %s2011_s18, 5  ;;  %v1790_v1 = vld [vmem:[%s2464_s1 + $0x8] sm:$0xff] (!%p225_p10)   ;;  %v1791_v2 = vld [vmem:[%s2464_s1 + $0x10] sm:$0xff] (!%p225_p10)   ;;  %s264_s12 = sand.u32 (!%p225_p10), 1, %s2003_s16  }
   0xf   : > { %228 = sbr.rel (%p225_p10) target bundleno = 365 (0x16d), region = 36  ;;  %p268_p11 = scmp.lt.s32.totalorder (!%p225_p10), %s1419_s5, 63  ;;  %1668 = vmatprep.subr.bf16.mxu0 (!%p225_p10), %v1789_v0  ;;  %1716 = vmatprep.subr.bf16.mxu1 (!%p225_p10), %v1789_v0  ;;  %v1792_v3 = vld [vmem:[%s2464_s1 + $0x18] sm:$0xff] (!%p225_p10)   ;;  %v1793_v6 = vld [vmem:[%s2464_s1 + $0x20] sm:$0xff] (!%p225_p10)   ;;  %v1794_v7 = vld [vmem:[%s2464_s1 + $0x28] sm:$0xff] (!%p225_p10)  }
  0x10   : > { %1669 = vmatpush3.bf16.msra.mxu0 (!%p225_p10), %v1789_v0  ;;  %1724 = vmatpush3.bf16.msra.mxu1 (!%p225_p10), %v1789_v0  ;;  %v1795_v8 = vld [vmem:[%s2464_s1 + $0x30] sm:$0xff] (!%p225_p10)   ;;  %v1796_v9 = vld [vmem:[%s2464_s1 + $0x38] sm:$0xff] (!%p225_p10)   ;;  %v2153_v24 = vld [vmem:[%s2465_s2] ss:$0 sm:$0xff] (!%p225_p10)  ;;  %s1548_s21 = sshll.u32 (!%p225_p10), %s2011_s18, 11  ;;  %s2417_s29 = scalar_lea.sflag (!%p225_p10), [#allocation4], %s264_s12 }
  0x11   : > { %1670 = vmatprep.subr.bf16.mxu0 (!%p225_p10), %v1790_v1  ;;  %1717 = vmatprep.subr.bf16.mxu1 (!%p225_p10), %v1790_v1  ;;  %v2158_v26 = vld [vmem:[%s2466_s3] ss:$0 sm:$0xff] (!%p225_p10)  ;;  %s2408_s18 = scalar_lea.hbm (!%p225_p10), %s2467_s4, %s1548_s21 }
  0x14   : > { %1671 = vmatpush3.bf16.msra.mxu0 (!%p225_p10), %v1790_v1  ;;  %1725 = vmatpush3.bf16.msra.mxu1 (!%p225_p10), %v1790_v1 }
  0x15   : > { %1672 = vmatprep.subr.bf16.mxu0 (!%p225_p10), %v1791_v2  ;;  %1718 = vmatprep.subr.bf16.mxu1 (!%p225_p10), %v1791_v2 }
  0x16   : > { %s2478_s5 = smov (!%p268_p11, %s1419_s5), 63 }
  0x17   : > { %s1420_s10 = sshll.u32 %s2478_s5, 2  ;;  %s2021_s5 = smov [#allocation3]  }
  0x18   : > { %s2117_s13 = scalar_lea.vmem %s2463_s0, %s1420_s10  ;;  %1673 = vmatpush3.bf16.msra.mxu0 %v1791_v2  ;;  %1726 = vmatpush3.bf16.msra.mxu1 %v1791_v2  ;;  %s1945_s6 = sshll.u32 %s2021_s5, 4  ;;  %s1946_s6 = int_to_ptr.vmem [resolvable:$false] %s1945_s6 }
  0x19   : > { %v1797_v4 = vld [vmem:[%s2117_s13] sm:$0xff]   ;;  %1674 = vmatprep.subr.bf16.mxu0 %v1792_v3  ;;  %1719 = vmatprep.subr.bf16.mxu1 %v1792_v3  ;;  %v1799_v10 = vld [vmem:[%s2117_s13 + $0x8] sm:$0xff]   ;;  %v1801_v12 = vld [vmem:[%s2117_s13 + $0x10] sm:$0xff]   ;;  %s1947_s7 = scalar_lea.vmem %s1946_s6, 4096 }
  0x1a   : > { %v1798_v5 = vld [vmem:[%s2117_s13 + $0x40] sm:$0xff]   ;;  %1684 = vmatprep.mubr.bf16.mxu0 %v1797_v4  ;;  %v1800_v11 = vld [vmem:[%s2117_s13 + $0x48] sm:$0xff]   ;;  %v1802_v13 = vld [vmem:[%s2117_s13 + $0x50] sm:$0xff]  }
  0x1b   : > { %1700 = vmatprep.mubr.bf16.mxu1 %v1798_v5  ;;  %v1803_v14 = vld [vmem:[%s2117_s13 + $0x18] sm:$0xff]   ;;  %v1805_v16 = vld [vmem:[%s2117_s13 + $0x20] sm:$0xff]   ;;  %v1807_v18 = vld [vmem:[%s2117_s13 + $0x28] sm:$0xff]  }
  0x1c   : > { %1675 = vmatpush3.bf16.msra.mxu0 %v1792_v3  ;;  %1727 = vmatpush3.bf16.msra.mxu1 %v1792_v3  ;;  %v1804_v15 = vld [vmem:[%s2117_s13 + $0x58] sm:$0xff]   ;;  %v1806_v17 = vld [vmem:[%s2117_s13 + $0x60] sm:$0xff]   ;;  %v1808_v19 = vld [vmem:[%s2117_s13 + $0x68] sm:$0xff]  }
  0x1d   : > { %1676 = vmatprep.subr.bf16.mxu0 %v1793_v6  ;;  %1720 = vmatprep.subr.bf16.mxu1 %v1793_v6  ;;  %v1809_v20 = vld [vmem:[%s2117_s13 + $0x30] sm:$0xff]   ;;  %v1811_v22 = vld [vmem:[%s2117_s13 + $0x38] sm:$0xff]  }
  0x1e   : > { %v1810_v21 = vld [vmem:[%s2117_s13 + $0x70] sm:$0xff]   ;;  %v1812_v23 = vld [vmem:[%s2117_s13 + $0x78] sm:$0xff]   ;;  %s2287_s13 = sshll.u32 %s264_s12, 7 }
  0x1f   : > { %s2318_s14 = scalar_lea.vmem [#allocation3], %s2287_s13 }
  0x20   : > { %1677 = vmatpush3.bf16.msra.mxu0 %v1793_v6  ;;  %1728 = vmatpush3.bf16.msra.mxu1 %v1793_v6  ;;  %s1290_s22 = sshll.u32 %s2318_s14, 4  ;;  %s2410_s22 = int_to_ptr.vmem [resolvable:$true] %s1290_s22 }
  0x21   : > { %1678 = vmatprep.subr.bf16.mxu0 %v1794_v7  ;;  %1721 = vmatprep.subr.bf16.mxu1 %v1794_v7  ;;  %s1941_s30 = scalar_lea.vmem %s2410_s22, 2048  ;;  %p1948_p1 = scmp.lt.s32.totalorder %s2410_s22, %s1946_s6 }
  0x22   : > { %p1942_p12 = scmp.ne.s32.totalorder %s2410_s22, %s1941_s30  ;;  %p1949_p2 = scmp.lt.s32.totalorder %s1947_s7, %s1941_s30 }
  0x24   : > { %1679 = vmatpush3.bf16.msra.mxu0 %v1794_v7  ;;  %1729 = vmatpush3.bf16.msra.mxu1 %v1794_v7  ;;  %p1943_p13 = pnand %p1942_p12, %p2089_p4  ;;  %p1950_p3 = por %p1949_p2, %p1948_p1 }
  0x25   : > { %1680 = vmatprep.subr.bf16.mxu0 %v1795_v8  ;;  %1722 = vmatprep.subr.bf16.mxu1 %v1795_v8 }
  0x26   : > { %p1944_p0 = pneg %p1943_p13 }
  0x28   : > { %1681 = vmatpush3.bf16.msra.mxu0 %v1795_v8  ;;  %1730 = vmatpush3.bf16.msra.mxu1 %v1795_v8  ;;  %p1951_p5 = pnand %p1950_p3, %p1944_p0 }
  0x29   : > { %1682 = vmatprep.subr.bf16.mxu0 %v1796_v9  ;;  %1723 = vmatprep.subr.bf16.mxu1 %v1796_v9 }
  0x2c   : > { %1683 = vmatpush3.bf16.msra.mxu0 %v1796_v9  ;;  %1731 = vmatpush3.bf16.msra.mxu1 %v1796_v9 }
  0x2f   : > { %1685 = vmatmul.mubr.bf16.vlgmr.msra.gmra.mrb[0].mxu0 %v1799_v10  ;;  %1701 = vmatmul.mubr.bf16.vlgmr.msra.gmra.mrb[0].mxu1 %v1800_v11 }
  0x30   : > { %1688 = vmatprep.mubr.bf16.mxu0 %v1801_v12  ;;  %1704 = vmatprep.mubr.bf16.mxu1 %v1802_v13 }
  0x37   : > { %1689 = vmatmul.mubr.bf16.gmra.mrb[4].mxu0 %v1803_v14  ;;  %1705 = vmatmul.mubr.bf16.gmra.mrb[4].mxu1 %v1804_v15 }
  0x38   : > { %1692 = vmatprep.mubr.bf16.mxu0 %v1805_v16  ;;  %1708 = vmatprep.mubr.bf16.mxu1 %v1806_v17 }
  0x3f   : > { %1693 = vmatmul.mubr.bf16.gmra.mrb[8].mxu0 %v1807_v18  ;;  %1709 = vmatmul.mubr.bf16.gmra.mrb[8].mxu1 %v1808_v19 }
  0x40   : > { %1696 = vmatprep.mubr.bf16.mxu0 %v1809_v20  ;;  %1712 = vmatprep.mubr.bf16.mxu1 %v1810_v21 }
  0x47   : > { %1697 = vmatmul.mubr.bf16.gmra.mrb[12].mxu0 %v1811_v22  ;;  %1713 = vmatmul.mubr.bf16.gmra.mrb[12].mxu1 %v1812_v23 }
 0x102   : > { %v1686_v25 = vpop.f32.mrb[0].mxu0  ;;  %v1702_v27 = vpop.f32.mrb[0].mxu1 }
 0x103   : > { %v822_v28 = vmul.f32 %v1686_v25, %v2153_v24  ;;  %v838_v29 = vmul.f32 %v1702_v27, %v2153_v24  ;;  %v587_v30 = vpop.f32.mrb[1].mxu0  ;;  %v651_v31 = vpop.f32.mrb[1].mxu1 }
 0x104   : > { %v820_v32 = vmul.f32 %v2153_v24, %v587_v30  ;;  %v836_v33 = vmul.f32 %v2153_v24, %v651_v31  ;;  %v1687_v34 = vpop.f32.mrb[2].mxu0  ;;  %v1703_v35 = vpop.f32.mrb[2].mxu1 }
 0x105   : > { %v2165_v36 = vadd.f32 %v2158_v26, %v822_v28  ;;  %v2168_v37 = vadd.f32 %v2158_v26, %v838_v29  ;;  %v823_v38 = vmul.f32 %v1687_v34, %v2153_v24  ;;  %v839_v39 = vmul.f32 %v1703_v35, %v2153_v24  ;;  %v590_v40 = vpop.f32.mrb[3].mxu0  ;;  %v654_v41 = vpop.f32.mrb[3].mxu1 }
 0x106   : > { %v2173_v42 = vadd.f32 %v2158_v26, %v820_v32  ;;  %v2176_v43 = vadd.f32 %v2158_v26, %v836_v33  ;;  %v821_v44 = vmul.f32 %v2153_v24, %v590_v40  ;;  %v837_v45 = vmul.f32 %v2153_v24, %v654_v41 }
 0x107   : > { %v1449_v46 = vmul.f32 -1.442695, %v2165_v36  ;;  %v1465_v47 = vmul.f32 -1.442695, %v2168_v37  ;;  %v2183_v48 = vadd.f32 %v2158_v26, %v823_v38  ;;  %v2186_v49 = vadd.f32 %v2158_v26, %v839_v39 }
 0x108   : > { %v1447_v50 = vmul.f32 -1.442695, %v2173_v42  ;;  %v1463_v51 = vmul.f32 -1.442695, %v2176_v43  ;;  %v2191_v52 = vadd.f32 %v2158_v26, %v821_v44  ;;  %v2194_v53 = vadd.f32 %v2158_v26, %v837_v45 }
 0x109   : > { %1813 = vpow2.f32 %v1449_v46  ;;  %v1450_v54 = vmul.f32 -1.442695, %v2183_v48  ;;  %v1466_v55 = vmul.f32 -1.442695, %v2186_v49 }
 0x10a   : > { %1815 = vpow2.f32 %v1465_v47  ;;  %v1690_v56 = vpop.f32.mrb[4].mxu0  ;;  %v1706_v57 = vpop.f32.mrb[4].mxu1  ;;  %v1448_v58 = vmul.f32 -1.442695, %v2191_v52  ;;  %v1464_v63 = vmul.f32 -1.442695, %v2194_v53 }
 0x10b   : > { %1817 = vpow2.f32 %v1447_v50  ;;  %v826_v59 = vmul.f32 %v1690_v56, %v2153_v24  ;;  %v842_v60 = vmul.f32 %v1706_v57, %v2153_v24  ;;  %v603_v61 = vpop.f32.mrb[5].mxu0  ;;  %v667_v62 = vpop.f32.mrb[5].mxu1 }
 0x10c   : > { %1819 = vpow2.f32 %v1463_v51  ;;  %v824_v0 = vmul.f32 %v2153_v24, %v603_v61  ;;  %v840_v1 = vmul.f32 %v2153_v24, %v667_v62  ;;  %v1691_v2 = vpop.f32.mrb[6].mxu0  ;;  %v1707_v3 = vpop.f32.mrb[6].mxu1 }
 0x10d   : > { %1821 = vpow2.f32 %v1450_v54  ;;  %v2205_v4 = vadd.f32 %v2158_v26, %v826_v59  ;;  %v2208_v5 = vadd.f32 %v2158_v26, %v842_v60  ;;  %v827_v6 = vmul.f32 %v1691_v2, %v2153_v24  ;;  %v606_v7 = vpop.f32.mrb[7].mxu0  ;;  %v670_v8 = vpop.f32.mrb[7].mxu1 }
 0x10e   : > { %1823 = vpow2.f32 %v1466_v55  ;;  %v2212_v9 = vadd.f32 %v2158_v26, %v824_v0  ;;  %v2215_v10 = vadd.f32 %v2158_v26, %v840_v1  ;;  %v843_v11 = vmul.f32 %v1707_v3, %v2153_v24 }
 0x10f   : > { %1825 = vpow2.f32 %v1448_v58  ;;  %v1453_v12 = vmul.f32 -1.442695, %v2205_v4  ;;  %v1469_v13 = vmul.f32 -1.442695, %v2208_v5  ;;  %v2221_v14 = vadd.f32 %v2158_v26, %v827_v6 }
 0x110   : > { %1827 = vpow2.f32 %v1464_v63  ;;  %v1451_v15 = vmul.f32 -1.442695, %v2212_v9  ;;  %v1467_v16 = vmul.f32 -1.442695, %v2215_v10  ;;  %v2227_v21 = vadd.f32 %v2158_v26, %v843_v11 }
 0x111   : > { %1829 = vpow2.f32 %v1453_v12  ;;  %v1454_v17 = vmul.f32 -1.442695, %v2221_v14  ;;  %v825_v28 = vmul.f32 %v2153_v24, %v606_v7  ;;  %v841_v29 = vmul.f32 %v2153_v24, %v670_v8 }
 0x112   : > { %1831 = vpow2.f32 %v1469_v13  ;;  %v1694_v18 = vpop.f32.mrb[8].mxu0  ;;  %v1710_v19 = vpop.f32.mrb[8].mxu1  ;;  %v2232_v44 = vmul.f32 -1.442695, %v2227_v21 }
 0x113   : > { %v1814_v20 = vpop.eup %1813  ;;  %1833 = vpow2.f32 %v1451_v15  ;;  %v619_v22 = vpop.f32.mrb[9].mxu0  ;;  %v2235_v47 = vadd.f32 %v2158_v26, %v825_v28  ;;  %v2238_v50 = vadd.f32 %v2158_v26, %v841_v29  ;;  %v830_v55 = vmul.f32 %v1694_v18, %v2153_v24 }
 0x114   : > { %v683_v23 = vpop.f32.mrb[9].mxu1  ;;  %v1816_v25 = vpop.eup %1815  ;;  %v989_v27 = vadd.f32 1.0, %v1814_v20  ;;  %1835 = vpow2.f32 %v1467_v16  ;;  %v846_v56 = vmul.f32 %v1710_v19, %v2153_v24  ;;  %v828_v59 = vmul.f32 %v2153_v24, %v619_v22 }
 0x115   : > { %v1695_v30 = vpop.f32.mrb[10].mxu0  ;;  %v1711_v31 = vpop.f32.mrb[10].mxu1  ;;  %v1005_v33 = vadd.f32 1.0, %v1816_v25  ;;  %1837 = vpow2.f32 %v1454_v17  ;;  %v844_v60 = vmul.f32 %v2153_v24, %v683_v23  ;;  %v1452_v11 = vmul.f32 -1.442695, %v2235_v47 }
 0x116   : > { %v1818_v32 = vpop.eup %1817  ;;  %v622_v34 = vpop.f32.mrb[11].mxu0  ;;  %1839 = vrcp.f32 %v989_v27  ;;  %v831_v1 = vmul.f32 %v1695_v30, %v2153_v24  ;;  %v847_v2 = vmul.f32 %v1711_v31, %v2153_v24  ;;  %v2257_v18 = vadd.f32 %v2158_v26, %v830_v55 }
 0x117   : > { %v1820_v35 = vpop.eup %1819  ;;  %v987_v38 = vadd.f32 1.0, %v1818_v32  ;;  %v686_v39 = vpop.f32.mrb[11].mxu1  ;;  %1841 = vrcp.f32 %v1005_v33  ;;  %v829_v12 = vmul.f32 %v2153_v24, %v622_v34  ;;  %v2260_v19 = vadd.f32 %v2158_v26, %v846_v56 }
 0x118   : > { %v1822_v40 = vpop.eup %1821  ;;  %v1003_v41 = vadd.f32 1.0, %v1820_v35  ;;  %v2267_v27 = vadd.f32 %v2158_v26, %v828_v59  ;;  %v2270_v28 = vadd.f32 %v2158_v26, %v844_v60  ;;  %v2274_v31 = vadd.f32 %v2158_v26, %v831_v1 }
 0x119   : > { %v1824_v45 = vpop.eup %1823  ;;  %1843 = vrcp.f32 %v987_v38  ;;  %v990_v46 = vadd.f32 1.0, %v1822_v40  ;;  %v2277_v32 = vadd.f32 %v2158_v26, %v847_v2  ;;  %v2280_v35 = vadd.f32 %v2158_v26, %v829_v12 }
 0x11a   : > { %v1826_v51 = vpop.eup %1825  ;;  %1845 = vrcp.f32 %v1003_v41  ;;  %v1006_v54 = vadd.f32 1.0, %v1824_v45  ;;  %v1698_v61 = vpop.f32.mrb[12].mxu0  ;;  %v845_v38 = vmul.f32 %v2153_v24, %v686_v39  ;;  %v1468_v41 = vmul.f32 -1.442695, %v2238_v50 }
 0x11b   : > { %v1828_v57 = vpop.eup %1827  ;;  %1847 = vrcp.f32 %v990_v46  ;;  %v988_v58 = vadd.f32 1.0, %v1826_v51  ;;  %v1714_v62 = vpop.f32.mrb[12].mxu1  ;;  %v1457_v45 = vmul.f32 -1.442695, %v2257_v18  ;;  %v1473_v51 = vmul.f32 -1.442695, %v2260_v19 }
 0x11c   : > { %v1830_v63 = vpop.eup %1829  ;;  %1849 = vrcp.f32 %v1006_v54  ;;  %v1004_v0 = vadd.f32 1.0, %v1828_v57  ;;  %v2246_v3 = vpop.f32.mrb[13].mxu0  ;;  %v834_v54 = vmul.f32 %v1698_v61, %v2153_v24  ;;  %v850_v55 = vmul.f32 %v1714_v62, %v2153_v24 }
 0x11d   : > { %v2248_v6 = vpop.f32.mrb[13].mxu1  ;;  %v1832_v7 = vpop.eup %1831  ;;  %1851 = vrcp.f32 %v988_v58  ;;  %v993_v8 = vadd.f32 1.0, %v1830_v63  ;;  %v1455_v39 = vmul.f32 -1.442695, %v2267_v27  ;;  %v1471_v57 = vmul.f32 -1.442695, %v2270_v28 }
 0x11e   : > { %v2252_v13 = vpop.f32.mrb[14].mxu0  ;;  %v2254_v15 = vpop.f32.mrb[14].mxu1  ;;  %1853 = vrcp.f32 %v1004_v0  ;;  %v1009_v17 = vadd.f32 1.0, %v1832_v7  ;;  %v1458_v58 = vmul.f32 -1.442695, %v2274_v31  ;;  %v2299_v0 = vadd.f32 %v2158_v26, %v845_v38 }
 0x11f   : > { %v1834_v16 = vpop.eup %1833  ;;  %v2262_v20 = vpop.f32.mrb[15].mxu0  ;;  %1855 = vrcp.f32 %v993_v8  ;;  %v1474_v60 = vmul.f32 -1.442695, %v2277_v32  ;;  %v1456_v63 = vmul.f32 -1.442695, %v2280_v35  ;;  %v2306_v8 = vadd.f32 %v2158_v26, %v834_v54 }
 0x120   : > { %v2264_v22 = vpop.f32.mrb[15].mxu1  ;;  %v1836_v23 = vpop.eup %1835  ;;  %v991_v25 = vadd.f32 1.0, %v1834_v16  ;;  %1857 = vrcp.f32 %v1009_v17 }
 0x121   : > { %v1838_v29 = vpop.eup %1837  ;;  %v1007_v30 = vadd.f32 1.0, %v1836_v23 }
 0x122   : > { %v1840_v33 = vpop.eup %1839  ;;  %1859 = vrcp.f32 %v991_v25  ;;  %v994_v34 = vadd.f32 1.0, %v1838_v29 }
 0x123   : > { %v1842_v40 = vpop.eup %1841  ;;  %1861 = vrcp.f32 %v1007_v30  ;;  %v1085_v62 = vmul.f32 %v1840_v33, %v2165_v36 }
 0x124   : > { %v1844_v46 = vpop.eup %1843  ;;  %1863 = vrcp.f32 %v994_v34 }
 0x125   : > { %v1846_v56 = vpop.eup %1845  ;;  %1865 = vpow2.f32 %v2232_v44  ;;  %v1101_v44 = vmul.f32 %v1842_v40, %v2168_v37  ;;  %v1083_v16 = vmul.f32 %v1844_v46, %v2173_v42 }
 0x126   : > { %v1848_v59 = vpop.eup %1847  ;;  %1867 = vpow2.f32 %v1452_v11  ;;  %v2309_v11 = vadd.f32 %v2158_v26, %v850_v55  ;;  %v1099_v17 = vmul.f32 %v1846_v56, %v2176_v43 }
 0x127   : > { %v1850_v61 = vpop.eup %1849  ;;  %v1086_v1 = vmul.f32 %v1848_v59, %v2183_v48  ;;  %1869 = vpow2.f32 %v1468_v41 }
 0x128   : > { %v1852_v2 = vpop.eup %1851  ;;  %v1102_v7 = vmul.f32 %v1850_v61, %v2186_v49  ;;  %1871 = vpow2.f32 %v1457_v45  ;;  %v1477_v33 = vmul.f32 -1.442695, %v2309_v11 }
 0x129   : > { %v1854_v12 = vpop.eup %1853  ;;  %v1557_v36 = vpack.c.bf16 %v1086_v1, %v1085_v62  ;;  %v1084_v37 = vmul.f32 %v1852_v2, %v2191_v52  ;;  %1873 = vpow2.f32 %v1473_v51  ;;  %v1472_v52 = vmul.f32 -1.442695, %v2299_v0 }
 0x12a   : > { %v1856_v48 = vpop.eup %1855  ;;  %v1597_v23 = vpack.c.bf16 %v1102_v7, %v1101_v44  ;;  %v1100_v49 = vmul.f32 %v1854_v12, %v2194_v53  ;;  %1875 = vpow2.f32 %v1455_v39  ;;  %v1461_v53 = vmul.f32 -1.442695, %v2306_v8 }
 0x12b   : > { %v2315_v25 = vpop.eup %1857  ;;  %1629 = vst [vmem:[%s2318_s14 + $0x8] sm:$0xff] %v1557_v36   ;;  %v1552_v42 = vpack.c.bf16 %v1084_v37, %v1083_v16  ;;  %1877 = vpow2.f32 %v1471_v57  ;;  %v1089_v40 = vmul.f32 %v1856_v48, %v2205_v4  ;;  %v832_v4 = vmul.f32 %v2153_v24, %v2246_v3 }
 0x12c   : > { %v2322_v29 = vpop.eup %1859  ;;  %1637 = vst [vmem:[%s2318_s14 + $0x48] sm:$0xff] %v1597_v23   ;;  %v1592_v43 = vpack.c.bf16 %v1100_v49, %v1099_v17  ;;  %1879 = vpow2.f32 %v1458_v58  ;;  %v835_v62 = vmul.f32 %v2252_v13, %v2153_v24  ;;  %v851_v2 = vmul.f32 %v2254_v15, %v2153_v24 }
 0x12d   : > { %v2326_v30 = vpop.eup %1861  ;;  %1553 = vst [vmem:[%s2318_s14] sm:$0xff] %v1552_v42   ;;  %1881 = vpow2.f32 %v1474_v60  ;;  %v848_v60 = vmul.f32 %v2153_v24, %v2248_v6  ;;  %v2343_v12 = vadd.f32 %v2158_v26, %v832_v4  ;;  %v833_v6 = vmul.f32 %v2153_v24, %v2262_v20 }
 0x12e   : > { %v1864_v34 = vpop.eup %1863  ;;  %1636 = vst [vmem:[%s2318_s14 + $0x40] sm:$0xff] %v1592_v43   ;;  %1883 = vpow2.f32 %v1456_v63  ;;  %v849_v37 = vmul.f32 %v2153_v24, %v2264_v22  ;;  %v2353_v17 = vadd.f32 %v2158_v26, %v835_v62  ;;  %v2356_v20 = vadd.f32 %v2158_v26, %v851_v2 }
 0x12f   : > { %v1866_v38 = vpop.eup %1865  ;;  %v1090_v41 = vmul.f32 %v1864_v34, %v2221_v14  ;;  %1885 = vpow2.f32 %v1472_v52  ;;  %v2348_v13 = vadd.f32 %v2158_v26, %v848_v60  ;;  %v1459_v52 = vmul.f32 -1.442695, %v2343_v12 }
 0x130   : > { %v1868_v45 = vpop.eup %1867  ;;  %v1010_v46 = vadd.f32 1.0, %v1866_v38  ;;  %1887 = vpow2.f32 %v1461_v53  ;;  %v2360_v43 = vadd.f32 %v2158_v26, %v833_v6  ;;  %v2364_v53 = vadd.f32 %v2158_v26, %v849_v37 }
 0x131   : > { %v1870_v51 = vpop.eup %1869  ;;  %v1567_v54 = vpack.c.bf16 %v1090_v41, %v1089_v40  ;;  %v992_v55 = vadd.f32 1.0, %v1868_v45  ;;  %1889 = vpow2.f32 %v1477_v33  ;;  %v1475_v22 = vmul.f32 -1.442695, %v2348_v13 }
 0x132   : > { %v1872_v56 = vpop.eup %1871  ;;  %1891 = vrcp.f32 %v1010_v46  ;;  %v1008_v39 = vadd.f32 1.0, %v1870_v51  ;;  %v1105_v34 = vmul.f32 %v2315_v25, %v2208_v5  ;;  %v1462_v40 = vmul.f32 -1.442695, %v2353_v17 }
 0x133   : > { %v1874_v57 = vpop.eup %1873  ;;  %1631 = vst [vmem:[%s2318_s14 + $0x18] sm:$0xff] %v1567_v54   ;;  %1893 = vrcp.f32 %v992_v55  ;;  %v997_v58 = vadd.f32 1.0, %v1872_v56  ;;  %v1087_v45 = vmul.f32 %v2322_v29, %v2212_v9  ;;  %v1103_v46 = vmul.f32 %v2326_v30, %v2215_v10 }
 0x134   : > { %v1876_v59 = vpop.eup %1875  ;;  %1895 = vrcp.f32 %v1008_v39  ;;  %v1013_v14 = vadd.f32 1.0, %v1874_v57  ;;  %v1478_v26 = vmul.f32 -1.442695, %v2356_v20  ;;  %v1476_v9 = vmul.f32 -1.442695, %v2364_v53 }
 0x135   : > { %v1878_v63 = vpop.eup %1877  ;;  %1897 = vrcp.f32 %v997_v58  ;;  %v995_v61 = vadd.f32 1.0, %v1876_v59 }
 0x136   : > { %v1880_v44 = vpop.eup %1879  ;;  %1899 = vrcp.f32 %v1013_v14  ;;  %v1011_v1 = vadd.f32 1.0, %v1878_v63 }
 0x137   : > { %v1882_v7 = vpop.eup %1881  ;;  %1901 = vrcp.f32 %v995_v61  ;;  %v998_v3 = vadd.f32 1.0, %v1880_v44 }
 0x138   : > { %v1884_v16 = vpop.eup %1883  ;;  %1903 = vrcp.f32 %v1011_v1  ;;  %v1014_v36 = vadd.f32 1.0, %v1882_v7 }
 0x139   : > { %v1886_v48 = vpop.eup %1885  ;;  %1905 = vrcp.f32 %v998_v3  ;;  %v996_v15 = vadd.f32 1.0, %v1884_v16 }
 0x13a   : > { %v1888_v23 = vpop.eup %1887  ;;  %1907 = vrcp.f32 %v1014_v36  ;;  %v1012_v49 = vadd.f32 1.0, %v1886_v48 }
 0x13b   : > { %v1890_v42 = vpop.eup %1889  ;;  %1909 = vrcp.f32 %v996_v15  ;;  %v1001_v62 = vadd.f32 1.0, %v1888_v23 }
 0x13c   : > { %v1892_v24 = vpop.eup %1891  ;;  %1911 = vrcp.f32 %v1012_v49  ;;  %v1017_v1 = vadd.f32 1.0, %v1890_v42 }
 0x13d   : > { %v1894_v33 = vpop.eup %1893  ;;  %v1106_v38 = vmul.f32 %v1892_v24, %v2227_v21  ;;  %1913 = vpow2.f32 %v1459_v52  ;;  %v1460_v21 = vmul.f32 -1.442695, %v2360_v43 }
 0x13e   : > { %v1896_v41 = vpop.eup %1895  ;;  %v1088_v51 = vmul.f32 %v1894_v33, %v2235_v47  ;;  %1915 = vpow2.f32 %v1475_v22 }
 0x13f   : > { %v1898_v54 = vpop.eup %1897  ;;  %v1607_v55 = vpack.c.bf16 %v1106_v38, %v1105_v34  ;;  %v1104_v5 = vmul.f32 %v1896_v41, %v2238_v50  ;;  %1917 = vpow2.f32 %v1462_v40 }
 0x140   : > { %v1900_v25 = vpop.eup %1899  ;;  %v1562_v56 = vpack.c.bf16 %v1088_v51, %v1087_v45  ;;  %1919 = vpow2.f32 %v1478_v26  ;;  %v1093_v50 = vmul.f32 %v1898_v54, %v2257_v18 }
 0x141   : > { %v1902_v29 = vpop.eup %1901  ;;  %1639 = vst [vmem:[%s2318_s14 + $0x58] sm:$0xff] %v1607_v55   ;;  %v1602_v10 = vpack.c.bf16 %v1104_v5, %v1103_v46  ;;  %1921 = vpow2.f32 %v1460_v21  ;;  %v1109_v4 = vmul.f32 %v1900_v25, %v2260_v19 }
 0x142   : > { %v1904_v47 = vpop.eup %1903  ;;  %1630 = vst [vmem:[%s2318_s14 + $0x10] sm:$0xff] %v1562_v56   ;;  %1923 = vpow2.f32 %v1476_v9  ;;  %v1091_v60 = vmul.f32 %v1902_v29, %v2267_v27 }
 0x143   : > { %v1906_v30 = vpop.eup %1905  ;;  %1638 = vst [vmem:[%s2318_s14 + $0x50] sm:$0xff] %v1602_v10   ;;  %v1107_v18 = vmul.f32 %v1904_v47, %v2270_v28  ;;  %1925 = vrcp.f32 %v1001_v62 }
 0x144   : > { %v1908_v39 = vpop.eup %1907  ;;  %v1094_v57 = vmul.f32 %v1906_v30, %v2274_v31  ;;  %1927 = vrcp.f32 %v1017_v1 }
 0x145   : > { %v1910_v58 = vpop.eup %1909  ;;  %v1110_v59 = vmul.f32 %v1908_v39, %v2277_v32 }
 0x146   : > { %v1912_v14 = vpop.eup %1911  ;;  %v1577_v63 = vpack.c.bf16 %v1094_v57, %v1093_v50  ;;  %v1092_v61 = vmul.f32 %v1910_v58, %v2280_v35 }
 0x147   : > { %v1617_v44 = vpack.c.bf16 %v1110_v59, %v1109_v4  ;;  %v1108_v31 = vmul.f32 %v1912_v14, %v2299_v0  ;;  %v1914_v19 = vpop.eup %1913 }
 0x148   : > { %1633 = vst [vmem:[%s2318_s14 + $0x28] sm:$0xff] %v1577_v63   ;;  %v1572_v2 = vpack.c.bf16 %v1092_v61, %v1091_v60  ;;  %v1916_v7 = vpop.eup %1915  ;;  %v999_v27 = vadd.f32 1.0, %v1914_v19 }
 0x149   : > { %1641 = vst [vmem:[%s2318_s14 + $0x68] sm:$0xff] %v1617_v44   ;;  %v1612_v32 = vpack.c.bf16 %v1108_v31, %v1107_v18  ;;  %v1918_v3 = vpop.eup %1917  ;;  %v1015_v35 = vadd.f32 1.0, %v1916_v7 }
 0x14a   : > { %1632 = vst [vmem:[%s2318_s14 + $0x20] sm:$0xff] %v1572_v2   ;;  %v1920_v6 = vpop.eup %1919  ;;  %1929 = vrcp.f32 %v999_v27  ;;  %v1002_v28 = vadd.f32 1.0, %v1918_v3 }
 0x14b   : > { %1640 = vst [vmem:[%s2318_s14 + $0x60] sm:$0xff] %v1612_v32   ;;  %v1922_v16 = vpop.eup %1921  ;;  %1931 = vrcp.f32 %v1015_v35  ;;  %v1018_v0 = vadd.f32 1.0, %v1920_v6 }
 0x14c   : > { %v1924_v36 = vpop.eup %1923  ;;  %1933 = vrcp.f32 %v1002_v28  ;;  %v1000_v37 = vadd.f32 1.0, %v1922_v16 }
 0x14d   : > { %1935 = vrcp.f32 %v1018_v0  ;;  %v1016_v48 = vadd.f32 1.0, %v1924_v36  ;;  %v1926_v15 = vpop.eup %1925 }
 0x14e   : > { %1937 = vrcp.f32 %v1000_v37  ;;  %v1928_v23 = vpop.eup %1927  ;;  %v1097_v22 = vmul.f32 %v1926_v15, %v2306_v8 }
 0x14f   : > { %1939 = vrcp.f32 %v1016_v48  ;;  %v1113_v38 = vmul.f32 %v1928_v23, %v2309_v11 }
 0x154   : > { %v1930_v49 = vpop.eup %1929 }
 0x155   : > { %v1932_v42 = vpop.eup %1931  ;;  %v1095_v45 = vmul.f32 %v1930_v49, %v2343_v12 }
 0x156   : > { %v1934_v52 = vpop.eup %1933 }
 0x157   : > { %v1936_v24 = vpop.eup %1935  ;;  %v1098_v33 = vmul.f32 %v1934_v52, %v2353_v17  ;;  %v1111_v17 = vmul.f32 %v1932_v42, %v2348_v13 }
 0x158   : > { %v1938_v34 = vpop.eup %1937  ;;  %v1114_v40 = vmul.f32 %v1936_v24, %v2356_v20 }
 0x159   : > { %v1940_v41 = vpop.eup %1939  ;;  %v1587_v46 = vpack.c.bf16 %v1098_v33, %v1097_v22  ;;  %v1096_v8 = vmul.f32 %v1938_v34, %v2360_v43 }
 0x15a   : > { %v1627_v51 = vpack.c.bf16 %v1114_v40, %v1113_v38  ;;  %v1112_v26 = vmul.f32 %v1940_v41, %v2364_v53 }
 0x15b   : > { %1635 = vst [vmem:[%s2318_s14 + $0x38] sm:$0xff] %v1587_v46   ;;  %v1582_v11 = vpack.c.bf16 %v1096_v8, %v1095_v45 }
 0x15c   : > { %1643 = vst [vmem:[%s2318_s14 + $0x78] sm:$0xff] %v1627_v51   ;;  %v1622_v12 = vpack.c.bf16 %v1112_v26, %v1111_v17 }
 0x15d   : > { %1634 = vst [vmem:[%s2318_s14 + $0x30] sm:$0xff] %v1582_v11  }
 0x15e   : > { %1642 = vst [vmem:[%s2318_s14 + $0x70] sm:$0xff] %v1622_v12  }
 0x15f   : > { %1954 = shalt.err (!%p1951_p5)
}
 0x160   : > { %s1955_s8 = scalar_lea.hbm %s2408_s18, 2048  ;;  %s1959_s11 = scalar_lea.hbm %s2467_s4, 4096 }
 0x161   : > { %p1956_p6 = scmp.ne.s32.totalorder %s2408_s18, %s1955_s8  ;;  %p1960_p10 = scmp.lt.u32.totalorder %s2408_s18, %s2467_s4 }
 0x162   : > { %p1961_p11 = scmp.lt.u32.totalorder %s1959_s11, %s1955_s8  ;;  %p1963_p13 = scmp.lt.u32.totalorder %s1955_s8, %s2408_s18 }
 0x163   : > { %p1957_p7 = pnand %p1956_p6, %p2089_p4 }
 0x164   : > { %p1962_p12 = por %p1961_p11, %p1960_p10 }
 0x165   : > { %p1958_p9 = pneg %p1957_p7 }
 0x166   : > { %p1964_p0 = por %p1963_p13, %p1962_p12 }
 0x168   : > { %p1965_p1 = pnand %p1964_p0, %p1958_p9 }
 0x16a   : > { %1968 = shalt.err (!%p1965_p1)
}
 0x16b   : > { %s2022_s14 = smov 64   ;;  %s2023_s21 = smov 4  }
 0x16c   : > { %1732 = dma.vmem_to_hbm [thread:$0]  (%p2089_p4), %s2410_s22, 2048, %s2408_s18, %s2417_s29, %s2022_s14, %s2022_s14, %s2023_s21  }
 0x16d PF: > { %p1738_p2 = scmp.ge.s32.totalorder %s2019_s20, 2  ;;  %s1305_s24 = sand.u32 1, %s1999_s15  }
 0x16e   : > { %s1306_s26 = scalar_lea.sflag [#allocation4], %s1305_s24 }
 0x16f   : > { %p1735_p3 = pnand %p1738_p2, %p2096_p8 }
 0x171   : > { %1994 = dma.done.wait (!%p1735_p3), %s1306_s26, 2048  }
 0x172   : > { %1996 = vsyncadd (!%p1735_p3), %s1306_s26, 4294965248  ;;  %s17_s20 = sadd.s32 1, %s2019_s20   ;;  %s2470_s15 = smov %s2003_s16 }
 0x173   : > { %p14_p5 = scmp.ge.s32.totalorder %s17_s20, 4   ;;  %s2471_s16 = smov %s2007_s17 }
 0x174   : > { %s2472_s17 = smov %s2102_s28  ;;  %s2473_s18 = smov %s2015_s19 }
 0x175   : > { %s2474_s19 = smov %s2476_s23  ;;  %16 = sbr.rel (!%p14_p5) target bundleno = 4 (0x4), region = 88 }
 0x17c   :  { %1311 = vsyncpa [#allocation4], 1 }
 0x17d   :  { %1313 = vsyncpa [#allocation4 + $0x1], 1 }

</bundles_post_ra>
